<compile_context>
chip_gen: v7x
topology: tpu7x:2x2x1
jax: 0.10.0
libtpu: 0.0.40
codegen_flags: <defaults>
</compile_context>

<pallas_src>
import functools

import jax
import jax.numpy as jnp
from jax import lax
from jax.experimental import pallas as pl
from jax.experimental.pallas import tpu as pltpu


def _round_up(x: int, m: int) -> int:
    return (x + m - 1) // m * m


def _vq_kernel(z_ref, emb_ref, esq_ref, q_ref, ids_ref):
    """One tile of rows: squared-L2 nearest neighbor + codebook decode.

    z_ref   : (tm, d)   encoder-output rows (input dtype)
    emb_ref : (Kp, d)   zero-padded codebook (input dtype)
    esq_ref : (1, Kp)   precomputed ||e||^2 in f32 (+BIG on padded rows)
    q_ref   : (tm, d)   quantized output rows
    ids_ref : (1, tm)   int32 token ids (lane-dense)
    """
    z = z_ref[...]                                 # (tm, d), input dtype
    e = emb_ref[...]                               # (Kp, d), input dtype
    tm = z.shape[0]
    kp = e.shape[0]

    # z . e_k on the MXU; contract the shared last dim directly (no transpose copy),
    # accumulate in f32.
    dots = lax.dot_general(
        z, e,
        dimension_numbers=(((1,), (1,)), ((), ())),
        preferred_element_type=jnp.float32,
    )                                              # (tm, Kp) f32

    # argmin_k ||z - e_k||^2 == argmin_k (||e_k||^2 - 2 z.e_k); ||z||^2 is constant
    # per row so it is dropped from the surrogate distance.
    dist = esq_ref[...] - 2.0 * dots               # (tm, Kp) f32 (broadcast over rows)

    # first-occurrence argmin over the codebook axis (matches torch.argmin)
    min_d = jnp.min(dist, axis=-1, keepdims=True)              # (tm, 1)
    col = lax.broadcasted_iota(jnp.int32, (tm, kp), 1)          # (tm, Kp)
    ids = jnp.min(jnp.where(dist == min_d, col, kp), axis=-1)   # (tm,) int32

    # lane-dense id store: one unmasked row of tm lanes
    ids_ref[...] = ids.reshape(1, tm).astype(jnp.int32)

    # decode: gather the selected codebook rows as a one-hot matmul (MXU-friendly)
    onehot = (ids[:, None] == col).astype(e.dtype)                  # (tm, Kp)
    quant = jnp.dot(onehot, e, preferred_element_type=jnp.float32)  # (tm, d)

    # forward of the straight-through estimator is exactly the quantized value;
    # the `z + (quant - z)` arithmetic from the PyTorch module is redundant here.
    q_ref[...] = quant.astype(q_ref.dtype)


@functools.partial(jax.jit, static_argnames=("tm",))
def vq_embeddings_forward(z, embedding, *, tm: int = 256):
    """Pallas forward of VectorQuantizedEmbeddings.

    z:         (b, s, d) float
    embedding: (K, d)    float codebook
    returns (quantized (b, s, d) in z.dtype, token_ids (b, s) int32)
    """
    b, s, d = z.shape
    K, ed = embedding.shape
    if ed != d:
        raise ValueError(
            f"Expected last dimension of input tensor ({d}) to be embedding size of {ed}"
        )

    n = b * s
    # Clamp tm for tiny inputs (stay a multiple of 128 for lane-dense id stores),
    # pad/mask the tail instead of asserting divisibility.
    tm_eff = min(tm, max(128, _round_up(n, 128)))
    n_pad = _round_up(n, tm_eff)
    k_pad = _round_up(K, 128)         # lane-align the codebook axis
    num_tiles = n_pad // tm_eff

    z_flat = z.reshape(n, d)
    if n_pad != n:
        z_flat = jnp.pad(z_flat, ((0, n_pad - n), (0, 0)))

    emb_p = embedding
    if k_pad != K:
        emb_p = jnp.pad(embedding, ((0, k_pad - K), (0, 0)))

    # hoisted, codebook-invariant work: ||e||^2 once (f32); padded codes can never win.
    e_sq = jnp.sum(emb_p.astype(jnp.float32) ** 2, axis=-1)
    if k_pad != K:
        e_sq = jnp.where(jnp.arange(k_pad) >= K, jnp.float32(1e30), e_sq)
    e_sq = e_sq.reshape(1, k_pad)

    # TODO(synk): for very large codebooks on v7x (64 MiB VMEM), single-buffer the
    # constant codebook block (pipeline_mode=pl.Buffered(1)) and/or raise vmem_limit_bytes.
    q_flat, ids_tiles = pl.pallas_call(
        _vq_kernel,
        out_shape=(
            jax.ShapeDtypeStruct((n_pad, d), z.dtype),
            jax.ShapeDtypeStruct((num_tiles, tm_eff), jnp.int32),
        ),
        grid_spec=pltpu.PrefetchScalarGridSpec(
            num_scalar_prefetch=0,
            grid=(num_tiles,),
            in_specs=[
                pl.BlockSpec((tm_eff, d), lambda i: (i, 0)),    # z rows tile
                pl.BlockSpec((k_pad, d), lambda i: (0, 0)),     # full (padded) codebook
                pl.BlockSpec((1, k_pad), lambda i: (0, 0)),     # ||e||^2 row
            ],
            out_specs=[
                pl.BlockSpec((tm_eff, d), lambda i: (i, 0)),    # quantized rows
                pl.BlockSpec((1, tm_eff), lambda i: (i, 0)),    # lane-dense ids
            ],
        ),
        compiler_params=pltpu.CompilerParams(
            dimension_semantics=("parallel",),                  # shards across TCs on v7x
        ),
    )(z_flat, emb_p, e_sq)

    quantized = q_flat[:n].reshape(b, s, d)
    token_ids = ids_tiles.reshape(n_pad)[:n].reshape(b, s)
    # TODO(synk): straight-through-estimator gradient (the .detach() in PyTorch) would
    # be added with jax.custom_vjp around this wrapper; forward values are identical.
    return quantized, token_ids


def _reference(z, embedding):
    # pure-JAX reference mirroring the PyTorch forward
    b, s, d = z.shape
    z_flat = z.reshape(-1, d)
    dist = jnp.sum((z_flat[:, None, :] - embedding[None, :, :]) ** 2, axis=-1)
    ids = jnp.argmin(dist, axis=-1).astype(jnp.int32)
    quant = embedding[ids]
    return quant.reshape(b, s, d), ids.reshape(b, s)


if __name__ == "__main__":
    # module config: num_embeddings=16, embedding_dim=32; input (b=2, s=8, d=32)
    num_embeddings = 16
    embedding_dim = 32
    b, s = 2, 8

    key = jax.random.PRNGKey(0)
    k_emb, k_z = jax.random.split(key)
    embedding = jax.random.normal(k_emb, (num_embeddings, embedding_dim), jnp.float32)
    z = jax.random.normal(k_z, (b, s, embedding_dim), jnp.float32)

    quantized, token_ids = vq_embeddings_forward(z, embedding)
    quantized = jax.block_until_ready(quantized)
    token_ids = jax.block_until_ready(token_ids)

    q_ref, ids_ref = _reference(z, embedding)
    assert quantized.shape == (b, s, embedding_dim)
    assert token_ids.shape == (b, s)
    assert token_ids.dtype == jnp.int32
    assert jnp.array_equal(token_ids, ids_ref)
    assert jnp.allclose(quantized, q_ref, atol=1e-5, rtol=1e-5)

    print("KERNEL_OK")
</pallas_src>

<mosaic_0001>
module attributes {stable_mosaic.version = 11 : i64} {
  func.func @_vq_kernel(%arg0: i32, %arg1: memref<128x32xf32, #tpu.memory_space<vmem>>, %arg2: memref<128x32xf32, #tpu.memory_space<vmem>>, %arg3: memref<1x128xf32, #tpu.memory_space<vmem>>, %arg4: memref<128x32xf32, #tpu.memory_space<vmem>>, %arg5: memref<1x128xi32, #tpu.memory_space<vmem>>) attributes {dimension_semantics = [#tpu.dimension_semantics<parallel>], iteration_bounds = array<i64: 1>, scalar_prefetch = 0 : i64, scratch_operands = 0 : i64, tpu.core_type = #tpu.core_type<tc>, window_params = [{transform_indices = @transform_0, window_bounds = array<i64: 128, 32>}, {pipeline_mode = #tpu.pipeline_mode<synchronous>, transform_indices = @transform_1, window_bounds = array<i64: 128, 32>}, {pipeline_mode = #tpu.pipeline_mode<synchronous>, transform_indices = @transform_2, window_bounds = array<i64: 1, 128>}, {transform_indices = @transform_3, window_bounds = array<i64: 128, 32>}, {transform_indices = @transform_4, window_bounds = array<i64: 1, 128>}]} {
    %c0 = arith.constant 0 : index
    %c0_0 = arith.constant 0 : index
    %0 = vector.load %arg1[%c0, %c0_0] : memref<128x32xf32, #tpu.memory_space<vmem>>, vector<128x32xf32>
    %c0_1 = arith.constant 0 : index
    %c0_2 = arith.constant 0 : index
    %1 = vector.load %arg2[%c0_1, %c0_2] : memref<128x32xf32, #tpu.memory_space<vmem>>, vector<128x32xf32>
    %cst = arith.constant dense<0.000000e+00> : vector<128x128xf32>
    %2 = tpu.matmul %0, %1, %cst {dimension_numbers = #tpu.dot_dimension_numbers<[1], [1], [0], [0], [0, 0, 1, 0], [], []>} : vector<128x32xf32>, vector<128x32xf32>, vector<128x128xf32> -> vector<128x128xf32>
    %c0_3 = arith.constant 0 : index
    %c0_4 = arith.constant 0 : index
    %3 = vector.load %arg3[%c0_3, %c0_4] : memref<1x128xf32, #tpu.memory_space<vmem>>, vector<1x128xf32>
    %cst_5 = arith.constant 2.000000e+00 : f32
    %4 = vector.broadcast %cst_5 : f32 to vector<128x128xf32>
    %5 = arith.mulf %4, %2 : vector<128x128xf32>
    %6 = vector.broadcast %3 : vector<1x128xf32> to vector<128x128xf32>
    %7 = arith.subf %6, %5 : vector<128x128xf32>
    %cst_6 = arith.constant dense<0x7F800000> : vector<128xf32>
    %8 = vector.multi_reduction <minimumf>, %7, %cst_6 [1] : vector<128x128xf32> to vector<128xf32>
    %9 = vector.shape_cast %8 : vector<128xf32> to vector<128x1xf32>
    %10 = tpu.iota {dimensions = array<i32: 1>} : vector<128x128xi32>
    %11 = vector.broadcast %9 : vector<128x1xf32> to vector<128x128xf32>
    %12 = arith.cmpf oeq, %7, %11 : vector<128x128xf32>
    %c128_i32 = arith.constant 128 : i32
    %13 = vector.broadcast %c128_i32 : i32 to vector<128x128xi32>
    %14 = arith.select %12, %10, %13 : vector<128x128xi1>, vector<128x128xi32>
    %cst_7 = arith.constant dense<2147483647> : vector<128xi32>
    %15 = vector.multi_reduction <minsi>, %14, %cst_7 [1] : vector<128x128xi32> to vector<128xi32>
    %16 = vector.shape_cast %15 : vector<128xi32> to vector<1x128xi32>
    %c0_8 = arith.constant 0 : index
    %c0_9 = arith.constant 0 : index
    %17 = vector.load %arg5[%c0_8, %c0_9] : memref<1x128xi32, #tpu.memory_space<vmem>>, vector<1x128xi32>
    tpu.vector_store %arg5[%c0_8, %c0_9], %16 {strides = array<i32>} : memref<1x128xi32, #tpu.memory_space<vmem>>, vector<1x128xi32>,
    %18 = vector.shape_cast %15 : vector<128xi32> to vector<128x1xi32>
    %19 = vector.broadcast %18 : vector<128x1xi32> to vector<128x128xi32>
    %20 = arith.cmpi eq, %19, %10 : vector<128x128xi32>
    %21 = arith.extui %20 : vector<128x128xi1> to vector<128x128xi32>
    %22 = arith.sitofp %21 : vector<128x128xi32> to vector<128x128xf32>
    %cst_10 = arith.constant dense<0.000000e+00> : vector<128x32xf32>
    %23 = tpu.matmul %22, %1, %cst_10 {dimension_numbers = #tpu.dot_dimension_numbers<[1], [0], [0], [1], [0, 0, 1, 1], [], []>} : vector<128x128xf32>, vector<128x32xf32>, vector<128x32xf32> -> vector<128x32xf32>
    %c0_11 = arith.constant 0 : index
    %c0_12 = arith.constant 0 : index
    %24 = vector.load %arg4[%c0_11, %c0_12] : memref<128x32xf32, #tpu.memory_space<vmem>>, vector<128x32xf32>
    tpu.vector_store %arg4[%c0_11, %c0_12], %23 {strides = array<i32>} : memref<128x32xf32, #tpu.memory_space<vmem>>, vector<128x32xf32>,
    return
  }
  func.func @transform_0(%arg0: i32) -> (i32, i32) {
    %c0_i32 = arith.constant 0 : i32
    %c0_i32_0 = arith.constant 0 : i32
    return %arg0, %c0_i32 : i32, i32
  }
  func.func @transform_1(%arg0: i32) -> (i32, i32) {
    %c0_i32 = arith.constant 0 : i32
    %c0_i32_0 = arith.constant 0 : i32
    %c0_i32_1 = arith.constant 0 : i32
    return %c0_i32, %c0_i32_0 : i32, i32
  }
  func.func @transform_2(%arg0: i32) -> (i32, i32) {
    %c0_i32 = arith.constant 0 : i32
    %c0_i32_0 = arith.constant 0 : i32
    %c0_i32_1 = arith.constant 0 : i32
    return %c0_i32, %c0_i32_0 : i32, i32
  }
  func.func @transform_3(%arg0: i32) -> (i32, i32) {
    %c0_i32 = arith.constant 0 : i32
    %c0_i32_0 = arith.constant 0 : i32
    return %arg0, %c0_i32 : i32, i32
  }
  func.func @transform_4(%arg0: i32) -> (i32, i32) {
    %c0_i32 = arith.constant 0 : i32
    %c0_i32_0 = arith.constant 0 : i32
    return %arg0, %c0_i32 : i32, i32
  }
}

</mosaic_0001>

<bundles_post_ra>
// kernel: vq_embeddings_forward.1
= control target key start
LH: loop header
LB: loop body
LE: loop exit
PB: predicated region body
PF: predicated region fallthrough
CT: control target
= control target key end

     0   :  { %vm48_vm0 = vcmask 261120   ;;  %s1897_s1 = inlined_call_operand.vmem [shape: f32[128,32], index: 1, kind: input, shape index: {}]   ;;  %s1898_s0 = inlined_call_operand.vmem [shape: f32[128,32], index: 0, kind: input, shape index: {}]   ;;  %s1899_s2 = inlined_call_operand.vmem [shape: f32[1,128], index: 2, kind: input, shape index: {}]   ;;  %s1900_s4 = inlined_call_operand.vmem [shape: s32[1,128], index: 4, kind: output, shape index: {1}]   ;;  %s1901_s3 = inlined_call_operand.vmem [shape: f32[128,32], index: 3, kind: output, shape index: {0}]  }
   0x1   :  { %v32_v0 = vld [vmem:[%s1897_s1] sm:$0xff]  ;;  %v33_v1 = vld [vmem:[%s1897_s1 + $0x8] sm:$0xff]  ;;  %vm1302_vm1 = vmpackc.low %vm48_vm0, %vm48_vm0 }
   0x2   :  { %v1187_v3 = vpack.c.bf16 %v33_v1, %v32_v0  ;;  %v34_v4 = vld [vmem:[%s1897_s1 + $0x10] sm:$0xff]  ;;  %v35_v5 = vld [vmem:[%s1897_s1 + $0x18] sm:$0xff]  ;;  %v36_v7 = vld [vmem:[%s1897_s1 + $0x20] sm:$0xff] }
   0x3   :  { %v1193_v6 = vpack.c.bf16 %v35_v5, %v34_v4  ;;  %v37_v8 = vld [vmem:[%s1897_s1 + $0x28] sm:$0xff]  ;;  %v16_v9 = vld [vmem:[%s1898_s0] sm:$0xff]  ;;  %v38_v11 = vld [vmem:[%s1897_s1 + $0x30] sm:$0xff] }
   0x4   :  { %1189 = vmatprep.subr.msk.bf16.mxu0 %vm1302_vm1, %v1187_v3  ;;  %1236 = vmatprep.subr.bf16.mxu1 %v1187_v3  ;;  %v1199_v10 = vpack.c.bf16 %v37_v8, %v36_v7  ;;  %v39_v12 = vld [vmem:[%s1897_s1 + $0x38] sm:$0xff]  ;;  %v40_v14 = vld [vmem:[%s1897_s1 + $0x40] sm:$0xff]  ;;  %v41_v15 = vld [vmem:[%s1897_s1 + $0x48] sm:$0xff] }
   0x5   :  { %1192 = vmatpush3.bf16.xpose.msk.msra.mxu0 %vm1302_vm1, %v1187_v3  ;;  %1238 = vmatpush3.bf16.msra.mxu1 %v1187_v3  ;;  %v1205_v13 = vpack.c.bf16 %v39_v12, %v38_v11  ;;  %v1211_v16 = vpack.c.bf16 %v41_v15, %v40_v14  ;;  %v42_v17 = vld [vmem:[%s1897_s1 + $0x50] sm:$0xff]  ;;  %v43_v18 = vld [vmem:[%s1897_s1 + $0x58] sm:$0xff]  ;;  %v44_v20 = vld [vmem:[%s1897_s1 + $0x60] sm:$0xff] }
   0x6   :  { %1195 = vmatprep.subr.msk.bf16.mxu0 %vm1302_vm1, %v1193_v6  ;;  %1240 = vmatprep.subr.bf16.mxu1 %v1193_v6  ;;  %v1217_v19 = vpack.c.bf16 %v43_v18, %v42_v17  ;;  %v45_v21 = vld [vmem:[%s1897_s1 + $0x68] sm:$0xff]  ;;  %v46_v23 = vld [vmem:[%s1897_s1 + $0x70] sm:$0xff]  ;;  %v47_v24 = vld [vmem:[%s1897_s1 + $0x78] sm:$0xff] }
   0x7   :  { %1107 = vmatprep.mubr.msk.f32.mxu0 %vm48_vm0, %v16_v9  ;;  %v1223_v22 = vpack.c.bf16 %v45_v21, %v44_v20  ;;  %v1229_v25 = vpack.c.bf16 %v47_v24, %v46_v23  ;;  %v17_v26 = vld [vmem:[%s1898_s0 + $0x8] sm:$0xff]  ;;  %v18_v27 = vld [vmem:[%s1898_s0 + $0x10] sm:$0xff]  ;;  %v19_v28 = vld [vmem:[%s1898_s0 + $0x18] sm:$0xff] }
   0x8   :  { %v20_v29 = vld [vmem:[%s1898_s0 + $0x20] sm:$0xff]  ;;  %v21_v30 = vld [vmem:[%s1898_s0 + $0x28] sm:$0xff]  ;;  %v22_v31 = vld [vmem:[%s1898_s0 + $0x30] sm:$0xff] }
   0x9   :  { %1242 = vmatpush3.bf16.msra.mxu1 %v1193_v6  ;;  %v23_v32 = vld [vmem:[%s1898_s0 + $0x38] sm:$0xff]  ;;  %v24_v33 = vld [vmem:[%s1898_s0 + $0x40] sm:$0xff]  ;;  %v25_v34 = vld [vmem:[%s1898_s0 + $0x48] sm:$0xff] }
   0xa   :  { %1244 = vmatprep.subr.bf16.mxu1 %v1199_v10  ;;  %v26_v35 = vld [vmem:[%s1898_s0 + $0x50] sm:$0xff]  ;;  %v27_v36 = vld [vmem:[%s1898_s0 + $0x58] sm:$0xff]  ;;  %v28_v37 = vld [vmem:[%s1898_s0 + $0x60] sm:$0xff] }
   0xb   :  { %v29_v38 = vld [vmem:[%s1898_s0 + $0x68] sm:$0xff]  ;;  %v30_v39 = vld [vmem:[%s1898_s0 + $0x70] sm:$0xff]  ;;  %v31_v40 = vld [vmem:[%s1898_s0 + $0x78] sm:$0xff] }
   0xc   :  { %v978_v43 = vld [vmem:[%s1899_s2] ss:$0 sm:$0xff] }
   0xd   :  { %1198 = vmatpush3.bf16.xpose.msk.msra.mxu0 %vm1302_vm1, %v1193_v6  ;;  %1246 = vmatpush3.bf16.msra.mxu1 %v1199_v10 }
   0xe   :  { %1201 = vmatprep.subr.msk.bf16.mxu0 %vm1302_vm1, %v1199_v10  ;;  %1248 = vmatprep.subr.bf16.mxu1 %v1205_v13 }
  0x11   :  { %1250 = vmatpush3.bf16.msra.mxu1 %v1205_v13 }
  0x12   :  { %1252 = vmatprep.subr.bf16.mxu1 %v1211_v16 }
  0x15   :  { %1204 = vmatpush3.bf16.xpose.msk.msra.mxu0 %vm1302_vm1, %v1199_v10  ;;  %1254 = vmatpush3.bf16.msra.mxu1 %v1211_v16 }
  0x16   :  { %1207 = vmatprep.subr.msk.bf16.mxu0 %vm1302_vm1, %v1205_v13  ;;  %1256 = vmatprep.subr.bf16.mxu1 %v1217_v19 }
  0x19   :  { %1258 = vmatpush3.bf16.msra.mxu1 %v1217_v19 }
  0x1a   :  { %1260 = vmatprep.subr.bf16.mxu1 %v1223_v22 }
  0x1d   :  { %1210 = vmatpush3.bf16.xpose.msk.msra.mxu0 %vm1302_vm1, %v1205_v13  ;;  %1262 = vmatpush3.bf16.msra.mxu1 %v1223_v22 }
  0x1e   :  { %1213 = vmatprep.subr.msk.bf16.mxu0 %vm1302_vm1, %v1211_v16  ;;  %1264 = vmatprep.subr.bf16.mxu1 %v1229_v25 }
  0x21   :  { %1266 = vmatpush3.bf16.msra.mxu1 %v1229_v25 }
  0x25   :  { %1216 = vmatpush3.bf16.xpose.msk.msra.mxu0 %vm1302_vm1, %v1211_v16 }
  0x26   :  { %1219 = vmatprep.subr.msk.bf16.mxu0 %vm1302_vm1, %v1217_v19 }
  0x2d   :  { %1222 = vmatpush3.bf16.xpose.msk.msra.mxu0 %vm1302_vm1, %v1217_v19 }
  0x2e   :  { %1225 = vmatprep.subr.msk.bf16.mxu0 %vm1302_vm1, %v1223_v22 }
  0x35   :  { %1228 = vmatpush3.bf16.xpose.msk.msra.mxu0 %vm1302_vm1, %v1223_v22 }
  0x36   :  { %1231 = vmatprep.subr.msk.bf16.mxu0 %vm1302_vm1, %v1229_v25 }
  0x3d   :  { %1234 = vmatpush3.bf16.xpose.msk.msra.mxu0 %vm1302_vm1, %v1229_v25 }
  0x44   :  { %1108 = vmatmul.mubr.msk.f32.vlgmr.msra.gmra.mrb[0].mxu0 %vm48_vm0, %v17_v26  ;;  %v361_v26 = vlaneseq }
  0x45   :  { %1110 = vmatprep.mubr.msk.f32.mxu0 %vm48_vm0, %v18_v27 }
  0x46   :  { %v1496_v27 = vand.u32 127, %v361_v26 }
  0x48   :  { %1111 = vmatmul.mubr.msk.f32.gmra.mrb[2].mxu0 %vm48_vm0, %v19_v28 }
  0x49   :  { %1113 = vmatprep.mubr.msk.f32.mxu0 %vm48_vm0, %v20_v29 }
  0x4c   :  { %1114 = vmatmul.mubr.msk.f32.gmra.mrb[4].mxu0 %vm48_vm0, %v21_v30 }
  0x4d   :  { %1116 = vmatprep.mubr.msk.f32.mxu0 %vm48_vm0, %v22_v31 }
  0x50   :  { %1117 = vmatmul.mubr.msk.f32.gmra.mrb[6].mxu0 %vm48_vm0, %v23_v32 }
  0x51   :  { %1119 = vmatprep.mubr.msk.f32.mxu0 %vm48_vm0, %v24_v33 }
  0x54   :  { %1120 = vmatmul.mubr.msk.f32.gmra.mrb[8].mxu0 %vm48_vm0, %v25_v34 }
  0x55   :  { %1122 = vmatprep.mubr.msk.f32.mxu0 %vm48_vm0, %v26_v35 }
  0x58   :  { %1123 = vmatmul.mubr.msk.f32.gmra.mrb[10].mxu0 %vm48_vm0, %v27_v36 }
  0x59   :  { %1125 = vmatprep.mubr.msk.f32.mxu0 %vm48_vm0, %v28_v37 }
  0x5c   :  { %1126 = vmatmul.mubr.msk.f32.gmra.mrb[12].mxu0 %vm48_vm0, %v29_v38 }
  0x5d   :  { %1128 = vmatprep.mubr.msk.f32.mxu0 %vm48_vm0, %v30_v39 }
  0x60   :  { %1129 = vmatmul.mubr.msk.f32.gmra.mrb[14].mxu0 %vm48_vm0, %v31_v40 }
 0x117   :  { %v1109_v41 = vpop.f32.mrb[0].mxu0 }
 0x118   :  { %v211_v42 = vpop.f32.mrb[1].mxu0  ;;  %v292_v45 = vmul.f32 2.0, %v1109_v41 }
 0x119   :  { %v291_v44 = vmul.f32 2.0, %v211_v42 }
 0x11a   :  { %v1450_v52 = vsub.f32 %v978_v43, %v292_v45 }
 0x11b   :  { %v1112_v46 = vpop.f32.mrb[2].mxu0  ;;  %v1447_v47 = vsub.f32 %v978_v43, %v291_v44 }
 0x11c   :  { %v221_v48 = vpop.f32.mrb[3].mxu0  ;;  %v294_v50 = vmul.f32 2.0, %v1112_v46 }
 0x11d   :  { %v293_v49 = vmul.f32 2.0, %v221_v48  ;;  %329 = vmin.xlane.f32.xlu0 %v1447_v47 }
 0x11e   :  { %v1456_v58 = vsub.f32 %v978_v43, %v294_v50 }
 0x11f   :  { %v1115_v51 = vpop.f32.mrb[4].mxu0  ;;  %v1452_v53 = vsub.f32 %v978_v43, %v293_v49 }
 0x120   :  { %v231_v54 = vpop.f32.mrb[5].mxu0  ;;  %v296_v56 = vmul.f32 2.0, %v1115_v51 }
 0x121   :  { %v295_v55 = vmul.f32 2.0, %v231_v54  ;;  %331 = vmin.xlane.f32.xlu0 %v1450_v52  ;;  %333 = vmin.xlane.f32.xlu1 %v1452_v53 }
 0x122   :  { %v1462_v0 = vsub.f32 %v978_v43, %v296_v56 }
 0x123   :  { %v1118_v57 = vpop.f32.mrb[6].mxu0  ;;  %v1458_v59 = vsub.f32 %v978_v43, %v295_v55 }
 0x124   :  { %v241_v60 = vpop.f32.mrb[7].mxu0  ;;  %v298_v62 = vmul.f32 2.0, %v1118_v57 }
 0x125   :  { %v297_v61 = vmul.f32 2.0, %v241_v60  ;;  %335 = vmin.xlane.f32.xlu1 %v1456_v58  ;;  %337 = vmin.xlane.f32.xlu0 %v1458_v59 }
 0x126   :  { %v1468_v6 = vsub.f32 %v978_v43, %v298_v62 }
 0x127   :  { %v1121_v63 = vpop.f32.mrb[8].mxu0  ;;  %v1464_v1 = vsub.f32 %v978_v43, %v297_v61 }
 0x128   :  { %v251_v2 = vpop.f32.mrb[9].mxu0  ;;  %v300_v4 = vmul.f32 2.0, %v1121_v63 }
 0x129   :  { %v299_v3 = vmul.f32 2.0, %v251_v2  ;;  %339 = vmin.xlane.f32.xlu1 %v1462_v0  ;;  %341 = vmin.xlane.f32.xlu0 %v1464_v1 }
 0x12a   :  { %v1474_v12 = vsub.f32 %v978_v43, %v300_v4 }
 0x12b   :  { %v1124_v5 = vpop.f32.mrb[10].mxu0  ;;  %v1470_v7 = vsub.f32 %v978_v43, %v299_v3 }
 0x12c   :  { %v261_v8 = vpop.f32.mrb[11].mxu0  ;;  %v302_v10 = vmul.f32 2.0, %v1124_v5 }
 0x12d   :  { %v301_v9 = vmul.f32 2.0, %v261_v8  ;;  %343 = vmin.xlane.f32.xlu1 %v1468_v6  ;;  %345 = vmin.xlane.f32.xlu0 %v1470_v7 }
 0x12e   :  { %v1480_v18 = vsub.f32 %v978_v43, %v302_v10 }
 0x12f   :  { %v1127_v11 = vpop.f32.mrb[12].mxu0  ;;  %v1476_v13 = vsub.f32 %v978_v43, %v301_v9 }
 0x130   :  { %v271_v14 = vpop.f32.mrb[13].mxu0  ;;  %v304_v16 = vmul.f32 2.0, %v1127_v11 }
 0x131   :  { %v303_v15 = vmul.f32 2.0, %v271_v14  ;;  %347 = vmin.xlane.f32.xlu1 %v1474_v12  ;;  %349 = vmin.xlane.f32.xlu0 %v1476_v13 }
 0x132   :  { %v1486_v23 = vsub.f32 %v978_v43, %v304_v16 }
 0x133   :  { %v1130_v17 = vpop.f32.mrb[14].mxu0  ;;  %v1482_v19 = vsub.f32 %v978_v43, %v303_v15 }
 0x134   :  { %v281_v20 = vpop.f32.mrb[15].mxu0  ;;  %v306_v22 = vmul.f32 2.0, %v1130_v17 }
 0x135   :  { %v305_v21 = vmul.f32 2.0, %v281_v20  ;;  %351 = vmin.xlane.f32.xlu1 %v1480_v18  ;;  %353 = vmin.xlane.f32.xlu0 %v1482_v19 }
 0x136   :  { %v1492_v25 = vsub.f32 %v978_v43, %v306_v22 }
 0x137   :  { %v1488_v24 = vsub.f32 %v978_v43, %v305_v21 }
 0x139   :  { %355 = vmin.xlane.f32.xlu1 %v1486_v23  ;;  %357 = vmin.xlane.f32.xlu0 %v1488_v24 }
 0x13d   :  { %359 = vmin.xlane.f32.xlu1 %v1492_v25 }
 0x1aa   :  { %v330_v28 = vpop.xlane.xlu0 %329 }
 0x1ab   :  { %vm363_vm2 = vcmp.eq.f32.partialorder %v1447_v47, %v330_v28 }
 0x1ac   :  { %v1500_v29 = vsel %vm363_vm2, %v1496_v27, 128 }
 0x1ad   :  { %v396_v30 = vshra.s32 %v1500_v29, 16 }
 0x1ae   :  { %v332_v31 = vpop.xlane.xlu0 %331  ;;  %v334_v32 = vpop.xlane.xlu1 %333 }
 0x1af   :  { %vm364_vm3 = vcmp.eq.f32.partialorder %v1450_v52, %v332_v31  ;;  %vm365_vm4 = vcmp.eq.f32.partialorder %v1452_v53, %v334_v32  ;;  %v1505_v33 = vcvt.s32.f32 %v396_v30  ;;  %v395_v32 = vand.u32 65535, %v1500_v29 }
 0x1b0   :  { %v1508_v34 = vsel %vm364_vm3, %v1496_v27, 128  ;;  %v1511_v35 = vsel %vm365_vm4, %v1496_v27, 128 }
 0x1b1   :  { %399 = vmin.xlane.f32.xlu0 %v1505_v33  ;;  %v410_v36 = vshra.s32 %v1508_v34, 16  ;;  %v424_v37 = vshra.s32 %v1511_v35, 16 }
 0x1b2   :  { %v336_v38 = vpop.xlane.xlu1 %335  ;;  %v338_v39 = vpop.xlane.xlu0 %337 }
 0x1b3   :  { %vm366_vm5 = vcmp.eq.f32.partialorder %v1456_v58, %v336_v38  ;;  %vm367_vm6 = vcmp.eq.f32.partialorder %v1458_v59, %v338_v39  ;;  %v1518_v40 = vcvt.s32.f32 %v410_v36  ;;  %v1520_v41 = vcvt.s32.f32 %v424_v37 }
 0x1b4   :  { %v1523_v42 = vsel %vm366_vm5, %v1496_v27, 128  ;;  %v1526_v43 = vsel %vm367_vm6, %v1496_v27, 128  ;;  %v423_v36 = vand.u32 65535, %v1511_v35  ;;  %v397_v38 = vcvt.s32.f32 %v395_v32 }
 0x1b5   :  { %413 = vmin.xlane.f32.xlu1 %v1518_v40  ;;  %427 = vmin.xlane.f32.xlu0 %v1520_v41  ;;  %v438_v44 = vshra.s32 %v1523_v42, 16  ;;  %v452_v45 = vshra.s32 %v1526_v43, 16 }
 0x1b6   :  { %v340_v46 = vpop.xlane.xlu1 %339  ;;  %v342_v47 = vpop.xlane.xlu0 %341 }
 0x1b7   :  { %vm368_vm7 = vcmp.eq.f32.partialorder %v1462_v0, %v340_v46  ;;  %vm369_vm8 = vcmp.eq.f32.partialorder %v1464_v1, %v342_v47  ;;  %v1534_v48 = vcvt.s32.f32 %v438_v44  ;;  %v1536_v49 = vcvt.s32.f32 %v452_v45 }
 0x1b8   :  { %v1539_v50 = vsel %vm368_vm7, %v1496_v27, 128  ;;  %v1542_v51 = vsel %vm369_vm8, %v1496_v27, 128  ;;  %v437_v44 = vand.u32 65535, %v1523_v42  ;;  %v451_v45 = vand.u32 65535, %v1526_v43 }
 0x1b9   :  { %441 = vmin.xlane.f32.xlu1 %v1534_v48  ;;  %455 = vmin.xlane.f32.xlu0 %v1536_v49  ;;  %v466_v52 = vshra.s32 %v1539_v50, 16  ;;  %v480_v53 = vshra.s32 %v1542_v51, 16  ;;  %v465_v42 = vand.u32 65535, %v1539_v50  ;;  %v479_v43 = vand.u32 65535, %v1542_v51 }
 0x1ba   :  { %v344_v54 = vpop.xlane.xlu1 %343  ;;  %v346_v55 = vpop.xlane.xlu0 %345 }
 0x1bb   :  { %vm370_vm9 = vcmp.eq.f32.partialorder %v1468_v6, %v344_v54  ;;  %vm371_vm10 = vcmp.eq.f32.partialorder %v1470_v7, %v346_v55  ;;  %v1550_v56 = vcvt.s32.f32 %v466_v52  ;;  %v1552_v57 = vcvt.s32.f32 %v480_v53 }
 0x1bc   :  { %v1555_v58 = vsel %vm370_vm9, %v1496_v27, 128  ;;  %v1558_v59 = vsel %vm371_vm10, %v1496_v27, 128  ;;  %v439_v54 = vcvt.s32.f32 %v437_v44  ;;  %v453_v55 = vcvt.s32.f32 %v451_v45 }
 0x1bd   :  { %469 = vmin.xlane.f32.xlu1 %v1550_v56  ;;  %483 = vmin.xlane.f32.xlu0 %v1552_v57  ;;  %v494_v60 = vshra.s32 %v1555_v58, 16  ;;  %v508_v61 = vshra.s32 %v1558_v59, 16  ;;  %v493_v50 = vand.u32 65535, %v1555_v58  ;;  %v507_v51 = vand.u32 65535, %v1558_v59 }
 0x1be   :  { %v348_v62 = vpop.xlane.xlu1 %347  ;;  %v350_v63 = vpop.xlane.xlu0 %349 }
 0x1bf   :  { %vm372_vm11 = vcmp.eq.f32.partialorder %v1474_v12, %v348_v62  ;;  %vm373_vm12 = vcmp.eq.f32.partialorder %v1476_v13, %v350_v63  ;;  %v1566_v0 = vcvt.s32.f32 %v494_v60  ;;  %v1568_v1 = vcvt.s32.f32 %v508_v61 }
 0x1c0   :  { %v1571_v2 = vsel %vm372_vm11, %v1496_v27, 128  ;;  %v1574_v3 = vsel %vm373_vm12, %v1496_v27, 128  ;;  %v467_v62 = vcvt.s32.f32 %v465_v42  ;;  %v481_v63 = vcvt.s32.f32 %v479_v43 }
 0x1c1   :  { %497 = vmin.xlane.f32.xlu1 %v1566_v0  ;;  %511 = vmin.xlane.f32.xlu0 %v1568_v1  ;;  %v522_v4 = vshra.s32 %v1571_v2, 16  ;;  %v536_v5 = vshra.s32 %v1574_v3, 16  ;;  %v521_v58 = vand.u32 65535, %v1571_v2  ;;  %v535_v59 = vand.u32 65535, %v1574_v3 }
 0x1c2   :  { %v352_v6 = vpop.xlane.xlu1 %351  ;;  %v354_v7 = vpop.xlane.xlu0 %353  ;;  %v1716_v43 = vshrl.u32 %v361_v26, 7 }
 0x1c3   :  { %vm374_vm13 = vcmp.eq.f32.partialorder %v1480_v18, %v352_v6  ;;  %vm375_vm14 = vcmp.eq.f32.partialorder %v1482_v19, %v354_v7  ;;  %v1582_v8 = vcvt.s32.f32 %v522_v4  ;;  %v1584_v9 = vcvt.s32.f32 %v536_v5 }
 0x1c4   :  { %v1587_v10 = vsel %vm374_vm13, %v1496_v27, 128  ;;  %v1590_v11 = vsel %vm375_vm14, %v1496_v27, 128  ;;  %v495_v6 = vcvt.s32.f32 %v493_v50  ;;  %v509_v7 = vcvt.s32.f32 %v507_v51 }
 0x1c5   :  { %525 = vmin.xlane.f32.xlu1 %v1582_v8  ;;  %539 = vmin.xlane.f32.xlu0 %v1584_v9  ;;  %v550_v12 = vshra.s32 %v1587_v10, 16  ;;  %v564_v13 = vshra.s32 %v1590_v11, 16  ;;  %v549_v2 = vand.u32 65535, %v1587_v10  ;;  %v563_v3 = vand.u32 65535, %v1590_v11 }
 0x1c6   :  { %v356_v14 = vpop.xlane.xlu1 %355  ;;  %v358_v15 = vpop.xlane.xlu0 %357  ;;  %v630_v50 = vadd.s32 4294967280, %v1496_v27 }
 0x1c7   :  { %vm376_vm15 = vcmp.eq.f32.partialorder %v1486_v23, %v356_v14  ;;  %vm377_vm1 = vcmp.eq.f32.partialorder %v1488_v24, %v358_v15  ;;  %v1598_v16 = vcvt.s32.f32 %v550_v12  ;;  %v1600_v17 = vcvt.s32.f32 %v564_v13 }
 0x1c8   :  { %v1603_v18 = vsel %vm376_vm15, %v1496_v27, 128  ;;  %v1606_v19 = vsel %vm377_vm1, %v1496_v27, 128  ;;  %v523_v14 = vcvt.s32.f32 %v521_v58  ;;  %v537_v15 = vcvt.s32.f32 %v535_v59 }
 0x1c9   :  { %553 = vmin.xlane.f32.xlu1 %v1598_v16  ;;  %567 = vmin.xlane.f32.xlu0 %v1600_v17  ;;  %v578_v20 = vshra.s32 %v1603_v18, 16  ;;  %v592_v21 = vshra.s32 %v1606_v19, 16  ;;  %v577_v10 = vand.u32 65535, %v1603_v18  ;;  %v591_v11 = vand.u32 65535, %v1606_v19 }
 0x1ca   :  { %v360_v22 = vpop.xlane.xlu1 %359 }
 0x1cb   :  { %vm378_vm2 = vcmp.eq.f32.partialorder %v1492_v25, %v360_v22  ;;  %v1613_v23 = vcvt.s32.f32 %v578_v20  ;;  %v1615_v24 = vcvt.s32.f32 %v592_v21  ;;  %v409_v25 = vand.u32 65535, %v1508_v34 }
 0x1cc   :  { %v1618_v28 = vsel %vm378_vm2, %v1496_v27, 128  ;;  %v425_v34 = vcvt.s32.f32 %v423_v36  ;;  %v551_v22 = vcvt.s32.f32 %v549_v2  ;;  %v593_v36 = vcvt.s32.f32 %v591_v11 }
 0x1cd   :  { %581 = vmin.xlane.f32.xlu1 %v1613_v23  ;;  %595 = vmin.xlane.f32.xlu0 %v1615_v24  ;;  %v606_v30 = vshra.s32 %v1618_v28, 16  ;;  %v411_v29 = vcvt.s32.f32 %v409_v25  ;;  %v605_v18 = vand.u32 65535, %v1618_v28  ;;  %v579_v25 = vcvt.s32.f32 %v577_v10 }
 0x1ce   :  { %v651_v11 = vadd.s32 4294967256, %v1496_v27 }
 0x1cf   :  { %v1623_v31 = vcvt.s32.f32 %v606_v30  ;;  %v565_v30 = vcvt.s32.f32 %v563_v3 }
 0x1d1   :  { %609 = vmin.xlane.f32.xlu1 %v1623_v31 }
 0x23e   :  { %v1629_v37 = vpop.xlane.xlu0 %399 }
 0x23f   :  { %vm401_vm3 = vcmp.eq.f32.partialorder %v1505_v33, %v1629_v37  ;;  %v406_v44 = vcvt.f32.s32 %v1629_v37  ;;  %v623_v37 = vadd.s32 4294967288, %v1496_v27 }
 0x240   :  { %v402_v39 = vsel %vm401_vm3, %v397_v38, inf }
 0x241   :  { %403 = vmin.xlane.f32.xlu0 %v402_v39  ;;  %v607_v39 = vcvt.s32.f32 %v605_v18  ;;  %v407_v42 = vshll.u32 %v406_v44, 16  ;;  %v654_v44 = vsub.s32 %v651_v11, %v1716_v43 }
 0x242   :  { %v1635_v46 = vpop.xlane.xlu1 %413  ;;  %v1637_v47 = vpop.xlane.xlu0 %427 }
 0x243   :  { %vm415_vm4 = vcmp.eq.f32.partialorder %v1518_v40, %v1635_v46  ;;  %vm429_vm5 = vcmp.eq.f32.partialorder %v1520_v41, %v1637_v47  ;;  %v420_v45 = vcvt.f32.s32 %v1635_v46 }
 0x244   :  { %v416_v35 = vsel %vm415_vm4, %v411_v29, inf  ;;  %v430_v33 = vsel %vm429_vm5, %v425_v34, inf  ;;  %vm628_vm4 = vcmask 130112  }
 0x245   :  { %417 = vmin.xlane.f32.xlu1 %v416_v35  ;;  %431 = vmin.xlane.f32.xlu0 %v430_v33  ;;  %v421_v46 = vshll.u32 %v420_v45, 16 }
 0x246   :  { %v1645_v52 = vpop.xlane.xlu1 %441  ;;  %v1647_v53 = vpop.xlane.xlu0 %455 }
 0x247   :  { %vm443_vm6 = vcmp.eq.f32.partialorder %v1534_v48, %v1645_v52  ;;  %vm457_vm7 = vcmp.eq.f32.partialorder %v1536_v49, %v1647_v53  ;;  %v462_v29 = vcvt.f32.s32 %v1647_v53 }
 0x248   :  { %v444_v40 = vsel %vm443_vm6, %v439_v54, inf  ;;  %v458_v41 = vsel %vm457_vm7, %v453_v55, inf  ;;  %vm635_vm6 = vcmask 195712   ;;  %vm642_vm7 = vcmask 261312  }
 0x249   :  { %445 = vmin.xlane.f32.xlu1 %v444_v40  ;;  %459 = vmin.xlane.f32.xlu0 %v458_v41  ;;  %v463_v53 = vshll.u32 %v462_v29, 16 }
 0x24a   :  { %v1655_v60 = vpop.xlane.xlu1 %469  ;;  %v1657_v61 = vpop.xlane.xlu0 %483 }
 0x24b   :  { %vm471_vm8 = vcmp.eq.f32.partialorder %v1550_v56, %v1655_v60  ;;  %vm485_vm9 = vcmp.eq.f32.partialorder %v1552_v57, %v1657_v61  ;;  %v476_v34 = vcvt.f32.s32 %v1655_v60  ;;  %v490_v35 = vcvt.f32.s32 %v1657_v61 }
 0x24c   :  { %v472_v48 = vsel %vm471_vm8, %v467_v62, inf  ;;  %v486_v49 = vsel %vm485_vm9, %v481_v63, inf  ;;  %vm649_vm8 = vcmask 326912  }
 0x24d   :  { %473 = vmin.xlane.f32.xlu1 %v472_v48  ;;  %487 = vmin.xlane.f32.xlu0 %v486_v49  ;;  %v1720_v55 = vshll.u32 %v476_v34, 16  ;;  %v1724_v51 = vshll.u32 %v490_v35, 16  ;;  %v626_v48 = vsub.s32 %v623_v37, %v1716_v43  ;;  %v621_v49 = vsub.s32 %v1496_v27, %v1716_v43 }
 0x24e   :  { %v1665_v4 = vpop.xlane.xlu1 %497  ;;  %v1667_v5 = vpop.xlane.xlu0 %511  ;;  %v665_v34 = vadd.s32 4294967240, %v1496_v27  ;;  %v672_v35 = vadd.s32 4294967232, %v1496_v27 }
 0x24f   :  { %vm499_vm10 = vcmp.eq.f32.partialorder %v1566_v0, %v1665_v4  ;;  %vm513_vm11 = vcmp.eq.f32.partialorder %v1568_v1, %v1667_v5  ;;  %v504_v33 = vcvt.f32.s32 %v1665_v4  ;;  %v637_v4 = vadd.s32 4294967272, %v1496_v27 }
 0x250   :  { %v500_v56 = vsel %vm499_vm10, %v495_v6, inf  ;;  %v514_v57 = vsel %vm513_vm11, %v509_v7, inf  ;;  %v633_v7 = vsub.s32 %v630_v50, %v1716_v43  ;;  %vm656_vm11 = vcmask 392512  }
 0x251   :  { %501 = vmin.xlane.f32.xlu1 %v500_v56  ;;  %515 = vmin.xlane.f32.xlu0 %v514_v57  ;;  %v1726_v60 = vshll.u32 %v504_v33, 16  ;;  %v644_v57 = vadd.s32 4294967264, %v1496_v27  ;;  %v640_v10 = vsub.s32 %v637_v4, %v1716_v43  ;;  %v675_v50 = vsub.s32 %v672_v35, %v1716_v43 }
 0x252   :  { %v1675_v12 = vpop.xlane.xlu1 %525  ;;  %v1677_v13 = vpop.xlane.xlu0 %539 }
 0x253   :  { %vm527_vm12 = vcmp.eq.f32.partialorder %v1582_v8, %v1675_v12  ;;  %vm541_vm13 = vcmp.eq.f32.partialorder %v1584_v9, %v1677_v13  ;;  %v546_v40 = vcvt.f32.s32 %v1677_v13 }
 0x254   :  { %v528_v0 = vsel %vm527_vm12, %v523_v14, inf  ;;  %v542_v1 = vsel %vm541_vm13, %v537_v15, inf  ;;  %v1268_v15 = vmov 1.0   ;;  %vm663_vm12 = vcmask 458112  }
 0x255   :  { %529 = vmin.xlane.f32.xlu1 %v528_v0  ;;  %543 = vmin.xlane.f32.xlu0 %v542_v1 }
 0x256   :  { %v1685_v20 = vpop.xlane.xlu1 %553  ;;  %v1687_v21 = vpop.xlane.xlu0 %567 }
 0x257   :  { %vm555_vm14 = vcmp.eq.f32.partialorder %v1598_v16, %v1685_v20  ;;  %vm569_vm15 = vcmp.eq.f32.partialorder %v1600_v17, %v1687_v21  ;;  %v560_v26 = vcvt.f32.s32 %v1685_v20  ;;  %v574_v63 = vcvt.f32.s32 %v1687_v21 }
 0x258   :  { %v556_v8 = vsel %vm555_vm14, %v551_v22, inf  ;;  %v570_v9 = vsel %vm569_vm15, %v565_v30, inf  ;;  %v647_v30 = vsub.s32 %v644_v57, %v1716_v43  ;;  %vm670_vm15 = vcmask 523712  }
 0x259   :  { %557 = vmin.xlane.f32.xlu1 %v556_v8  ;;  %571 = vmin.xlane.f32.xlu0 %v570_v9  ;;  %v1742_v2 = vshll.u32 %v560_v26, 16  ;;  %v1745_v13 = vshll.u32 %v574_v63, 16  ;;  %v658_v9 = vadd.s32 4294967248, %v1496_v27 }
 0x25a   :  { %v1694_v32 = vpop.xlane.xlu1 %581  ;;  %v1696_v19 = vpop.xlane.xlu0 %595 }
 0x25b   :  { %vm583_vm1 = vcmp.eq.f32.partialorder %v1613_v23, %v1694_v32  ;;  %vm597_vm2 = vcmp.eq.f32.partialorder %v1615_v24, %v1696_v19  ;;  %v434_v23 = vcvt.f32.s32 %v1637_v47  ;;  %v448_v24 = vcvt.f32.s32 %v1645_v52 }
 0x25c   :  { %v584_v16 = vsel %vm583_vm1, %v579_v25, inf  ;;  %v598_v17 = vsel %vm597_vm2, %v593_v36, inf  ;;  %v532_v52 = vcvt.f32.s32 %v1675_v12  ;;  %v588_v14 = vcvt.f32.s32 %v1694_v32 }
 0x25d   :  { %585 = vmin.xlane.f32.xlu1 %v584_v16  ;;  %599 = vmin.xlane.f32.xlu0 %v598_v17  ;;  %v435_v47 = vshll.u32 %v434_v23, 16  ;;  %v449_v54 = vshll.u32 %v448_v24, 16  ;;  %v602_v20 = vcvt.f32.s32 %v1696_v19  ;;  %v661_v24 = vsub.s32 %v658_v9, %v1716_v43 }
 0x25e   :  { %v1702_v38 = vpop.xlane.xlu1 %609  ;;  %v1735_v58 = vshll.u32 %v532_v52, 16  ;;  %v1754_v16 = vshll.u32 %v588_v14, 16  ;;  %v679_v52 = vadd.s32 4294967224, %v1496_v27  ;;  %vm677_vm1 = vcmask 589312  }
 0x25f   :  { %vm611_vm3 = vcmp.eq.f32.partialorder %v1623_v31, %v1702_v38  ;;  %v518_v31 = vcvt.f32.s32 %v1667_v5  ;;  %v1738_v5 = vshll.u32 %v546_v40, 16  ;;  %v668_v40 = vsub.s32 %v665_v34, %v1716_v43 }
 0x260   :  { %v612_v28 = vsel %vm611_vm3, %v607_v39, inf  ;;  %v700_v14 = vadd.s32 4294967200, %v1496_v27 }
 0x261   :  { %613 = vmin.xlane.f32.xlu1 %v612_v28  ;;  %v1729_v62 = vshll.u32 %v518_v31, 16 }
 0x2ce   :  { %v404_v41 = vpop.xlane.xlu0 %403 }
 0x2cf   :  { %v405_v61 = vcvt.f32.s32 %v404_v41 }
 0x2d1   :  { %v408_v59 = vadd.s32 %v407_v42, %v405_v61  ;;  %v686_v61 = vadd.s32 4294967216, %v1496_v27 }
 0x2d2   :  { %v418_v6 = vpop.xlane.xlu1 %417  ;;  %v432_v56 = vpop.xlane.xlu0 %431 }
 0x2d3   :  { %v419_v3 = vcvt.f32.s32 %v418_v6  ;;  %v433_v12 = vcvt.f32.s32 %v432_v56  ;;  %vm729_vm5 = vcmp.eq.s32.totalorder %v408_v59, %v1496_v27  ;;  %v622_v21 = vrot.slane %v408_v59, %v621_v49 }
 0x2d4   :  { %1163 = vmatprep.mubr.msk.f32.mxu1 %vm729_vm5, %v1268_v15  ;;  %v682_v6 = vsub.s32 %v679_v52, %v1716_v43  ;;  %v689_v57 = vsub.s32 %v686_v61, %v1716_v43 }
 0x2d5   :  { %v422_v0 = vadd.s32 %v421_v46, %v419_v3  ;;  %v436_v1 = vadd.s32 %v435_v47, %v433_v12  ;;  %v693_v12 = vadd.s32 4294967208, %v1496_v27 }
 0x2d6   :  { %v446_v22 = vpop.xlane.xlu1 %445  ;;  %v460_v8 = vpop.xlane.xlu0 %459 }
 0x2d7   :  { %v627_v18 = vrot.slane %v422_v0, %v626_v48  ;;  %v634_v32 = vrot.slane %v436_v1, %v633_v7  ;;  %v447_v25 = vcvt.f32.s32 %v446_v22  ;;  %v461_v36 = vcvt.f32.s32 %v460_v8 }
 0x2d8   :  { %vm730_vm9 = vcmp.eq.s32.totalorder %v422_v0, %v1496_v27  ;;  %vm731_vm10 = vcmp.eq.s32.totalorder %v436_v1, %v1496_v27  ;;  %v696_v19 = vsub.s32 %v693_v12, %v1716_v43  ;;  %v703_v8 = vsub.s32 %v700_v14, %v1716_v43 }
 0x2d9   :  { %v629_v17 = vsel %vm628_vm4, %v627_v18, %v622_v21  ;;  %v450_v39 = vadd.s32 %v449_v54, %v447_v25  ;;  %v464_v28 = vadd.s32 %v463_v53, %v461_v36  ;;  %1164 = vmatmul.mubr.msk.f32.vlgmr.msra.gmra.mrb[0].mxu1 %vm730_vm9, %v1268_v15  ;;  %vm684_vm4 = vcmask 654912  }
 0x2da   :  { %v636_v45 = vsel %vm635_vm6, %v634_v32, %v629_v17  ;;  %1166 = vmatprep.mubr.msk.f32.mxu1 %vm731_vm10, %v1268_v15  ;;  %v474_v23 = vpop.xlane.xlu1 %473  ;;  %v488_v29 = vpop.xlane.xlu0 %487  ;;  %v707_v18 = vadd.s32 4294967192, %v1496_v27  ;;  %v714_v17 = vadd.s32 4294967184, %v1496_v27  ;;  %vm698_vm10 = vcmask 786112  }
 0x2db   :  { %v641_v33 = vrot.slane %v450_v39, %v640_v10  ;;  %v648_v42 = vrot.slane %v464_v28, %v647_v30  ;;  %v475_v31 = vcvt.f32.s32 %v474_v23  ;;  %v489_v37 = vcvt.f32.s32 %v488_v29 }
 0x2dc   :  { %vm732_vm13 = vcmp.eq.s32.totalorder %v450_v39, %v1496_v27  ;;  %vm733_vm14 = vcmp.eq.s32.totalorder %v464_v28, %v1496_v27  ;;  %v603_v10 = vshll.u32 %v602_v20, 16  ;;  %v721_v29 = vadd.s32 4294967176, %v1496_v27 }
 0x2dd   :  { %v643_v46 = vsel %vm642_vm7, %v641_v33, %v636_v45  ;;  %v478_v47 = vadd.s32 %v1720_v55, %v475_v31  ;;  %v492_v54 = vadd.s32 %v1724_v51, %v489_v37  ;;  %1167 = vmatmul.mubr.msk.f32.gmra.mrb[2].mxu1 %vm732_vm13, %v1268_v15  ;;  %vm691_vm7 = vcmask 720512  }
 0x2de   :  { %v650_v53 = vsel %vm649_vm8, %v648_v42, %v643_v46  ;;  %1169 = vmatprep.mubr.msk.f32.mxu1 %vm733_vm14, %v1268_v15  ;;  %v502_v41 = vpop.xlane.xlu1 %501  ;;  %v516_v26 = vpop.xlane.xlu0 %515  ;;  %vm712_vm14 = vcmask 917312  }
 0x2df   :  { %v655_v63 = vrot.slane %v478_v47, %v654_v44  ;;  %v662_v55 = vrot.slane %v492_v54, %v661_v24  ;;  %v503_v48 = vcvt.f32.s32 %v502_v41  ;;  %v517_v51 = vcvt.f32.s32 %v516_v26 }
 0x2e0   :  { %vm734_vm2 = vcmp.eq.s32.totalorder %v478_v47, %v1496_v27  ;;  %vm735_vm3 = vcmp.eq.s32.totalorder %v492_v54, %v1496_v27 }
 0x2e1   :  { %v657_v49 = vsel %vm656_vm11, %v655_v63, %v650_v53  ;;  %v506_v59 = vadd.s32 %v1726_v60, %v503_v48  ;;  %v520_v4 = vadd.s32 %v1729_v62, %v517_v51  ;;  %1170 = vmatmul.mubr.msk.f32.gmra.mrb[4].mxu1 %vm734_vm2, %v1268_v15  ;;  %vm705_vm11 = vcmask 851712  }
 0x2e2   :  { %v664_v7 = vsel %vm663_vm12, %v662_v55, %v657_v49  ;;  %1172 = vmatprep.mubr.msk.f32.mxu1 %vm735_vm3, %v1268_v15  ;;  %v530_v56 = vpop.xlane.xlu1 %529  ;;  %v544_v3 = vpop.xlane.xlu0 %543  ;;  %v724_v53 = vsub.s32 %v721_v29, %v1716_v43  ;;  %vm719_vm2 = vcmask 982912   ;;  %vm726_vm3 = vcmask 1048512  }
 0x2e3   :  { %v669_v0 = vrot.slane %v506_v59, %v668_v40  ;;  %v676_v60 = vrot.slane %v520_v4, %v675_v50  ;;  %v531_v1 = vcvt.f32.s32 %v530_v56  ;;  %v545_v62 = vcvt.f32.s32 %v544_v3 }
 0x2e4   :  { %vm736_vm5 = vcmp.eq.s32.totalorder %v506_v59, %v1496_v27  ;;  %vm737_vm6 = vcmp.eq.s32.totalorder %v520_v4, %v1496_v27 }
 0x2e5   :  { %v671_v11 = vsel %vm670_vm15, %v669_v0, %v664_v7  ;;  %v534_v21 = vadd.s32 %v1735_v58, %v531_v1  ;;  %v548_v22 = vadd.s32 %v1738_v5, %v545_v62  ;;  %1173 = vmatmul.mubr.msk.f32.gmra.mrb[6].mxu1 %vm736_vm5, %v1268_v15  ;;  %v616_v5 = vcvt.f32.s32 %v1702_v38 }
 0x2e6   :  { %v678_v30 = vsel %vm677_vm1, %v676_v60, %v671_v11  ;;  %1175 = vmatprep.mubr.msk.f32.mxu1 %vm737_vm6, %v1268_v15  ;;  %v558_v20 = vpop.xlane.xlu1 %557  ;;  %v572_v9 = vpop.xlane.xlu0 %571  ;;  %v710_v38 = vsub.s32 %v707_v18, %v1716_v43 }
 0x2e7   :  { %v683_v32 = vrot.slane %v534_v21, %v682_v6  ;;  %v690_v25 = vrot.slane %v548_v22, %v689_v57  ;;  %v559_v58 = vcvt.f32.s32 %v558_v20  ;;  %v573_v36 = vcvt.f32.s32 %v572_v9 }
 0x2e8   :  { %vm738_vm8 = vcmp.eq.s32.totalorder %v534_v21, %v1496_v27  ;;  %vm739_vm9 = vcmp.eq.s32.totalorder %v548_v22, %v1496_v27  ;;  %v617_v46 = vshll.u32 %v616_v5, 16 }
 0x2e9   :  { %v685_v39 = vsel %vm684_vm4, %v683_v32, %v678_v30  ;;  %v562_v28 = vadd.s32 %v1742_v2, %v559_v58  ;;  %v576_v44 = vadd.s32 %v1745_v13, %v573_v36  ;;  %1176 = vmatmul.mubr.msk.f32.gmra.mrb[8].mxu1 %vm738_vm8, %v1268_v15  ;;  %v717_v2 = vsub.s32 %v714_v17, %v1716_v43 }
 0x2ea   :  { %v692_v45 = vsel %vm691_vm7, %v690_v25, %v685_v39  ;;  %1178 = vmatprep.mubr.msk.f32.mxu1 %vm739_vm9, %v1268_v15  ;;  %v586_v23 = vpop.xlane.xlu1 %585  ;;  %v600_v24 = vpop.xlane.xlu0 %599 }
 0x2eb   :  { %v697_v34 = vrot.slane %v562_v28, %v696_v19  ;;  %v704_v35 = vrot.slane %v576_v44, %v703_v8  ;;  %v587_v33 = vcvt.f32.s32 %v586_v23  ;;  %v601_v42 = vcvt.f32.s32 %v600_v24 }
 0x2ec   :  { %vm740_vm12 = vcmp.eq.s32.totalorder %v562_v28, %v1496_v27  ;;  %vm741_vm13 = vcmp.eq.s32.totalorder %v576_v44, %v1496_v27 }
 0x2ed   :  { %v699_v13 = vsel %vm698_vm10, %v697_v34, %v692_v45  ;;  %v590_v31 = vadd.s32 %v1754_v16, %v587_v33  ;;  %v604_v37 = vadd.s32 %v603_v10, %v601_v42  ;;  %1179 = vmatmul.mubr.msk.f32.gmra.mrb[10].mxu1 %vm740_vm12, %v1268_v15 }
 0x2ee   :  { %v706_v47 = vsel %vm705_vm11, %v704_v35, %v699_v13  ;;  %1181 = vmatprep.mubr.msk.f32.mxu1 %vm741_vm13, %v1268_v15  ;;  %v614_v54 = vpop.xlane.xlu1 %613 }
 0x2ef   :  { %v711_v52 = vrot.slane %v590_v31, %v710_v38  ;;  %v615_v40 = vcvt.f32.s32 %v614_v54  ;;  %vm742_vm15 = vcmp.eq.s32.totalorder %v590_v31, %v1496_v27  ;;  %v718_v41 = vrot.slane %v604_v37, %v717_v2 }
 0x2f0   :  { %vm743_vm1 = vcmp.eq.s32.totalorder %v604_v37, %v1496_v27 }
 0x2f1   :  { %v713_v16 = vsel %vm712_vm14, %v711_v52, %v706_v47  ;;  %v618_v50 = vadd.s32 %v617_v46, %v615_v40  ;;  %1182 = vmatmul.mubr.msk.f32.gmra.mrb[12].mxu1 %vm742_vm15, %v1268_v15 }
 0x2f2   :  { %1184 = vmatprep.mubr.msk.f32.mxu1 %vm743_vm1, %v1268_v15  ;;  %v720_v61 = vsel %vm719_vm2, %v718_v41, %v713_v16 }
 0x2f3   :  { %v725_v26 = vrot.slane %v618_v50, %v724_v53  ;;  %vm744_vm4 = vcmp.eq.s32.totalorder %v618_v50, %v1496_v27 }
 0x2f5   :  { %v727_v63 = vsel %vm726_vm3, %v725_v26, %v720_v61  ;;  %1185 = vmatmul.mubr.msk.f32.gmra.mrb[14].mxu1 %vm744_vm4, %v1268_v15 }
 0x2f6   :  { %728 = vst [vmem:[%s1900_s4] sm:$0x1] %v727_v63 }
 0x3ac   :  { %v1165_v43 = vpop.f32.mrb[0].mxu1 }
 0x3ad   :  { %923 = vst.msk [vmem:[%s1901_s3 + $0x8] sm:$0xff] %vm48_vm0, %v1165_v43  ;;  %v843_v55 = vpop.f32.mrb[1].mxu1 }
 0x3ae   :  { %922 = vst.msk [vmem:[%s1901_s3] sm:$0xff] %vm48_vm0, %v843_v55 }
 0x3b0   :  { %v1168_v27 = vpop.f32.mrb[2].mxu1 }
 0x3b1   :  { %925 = vst.msk [vmem:[%s1901_s3 + $0x18] sm:$0xff] %vm48_vm0, %v1168_v27  ;;  %v853_v15 = vpop.f32.mrb[3].mxu1 }
 0x3b2   :  { %924 = vst.msk [vmem:[%s1901_s3 + $0x10] sm:$0xff] %vm48_vm0, %v853_v15 }
 0x3b4   :  { %v1171_v48 = vpop.f32.mrb[4].mxu1 }
 0x3b5   :  { %927 = vst.msk [vmem:[%s1901_s3 + $0x28] sm:$0xff] %vm48_vm0, %v1171_v48  ;;  %v863_v51 = vpop.f32.mrb[5].mxu1 }
 0x3b6   :  { %926 = vst.msk [vmem:[%s1901_s3 + $0x20] sm:$0xff] %vm48_vm0, %v863_v51 }
 0x3b8   :  { %v1174_v49 = vpop.f32.mrb[6].mxu1 }
 0x3b9   :  { %929 = vst.msk [vmem:[%s1901_s3 + $0x38] sm:$0xff] %vm48_vm0, %v1174_v49  ;;  %v873_v59 = vpop.f32.mrb[7].mxu1 }
 0x3ba   :  { %928 = vst.msk [vmem:[%s1901_s3 + $0x30] sm:$0xff] %vm48_vm0, %v873_v59 }
 0x3bc   :  { %v1177_v4 = vpop.f32.mrb[8].mxu1 }
 0x3bd   :  { %931 = vst.msk [vmem:[%s1901_s3 + $0x48] sm:$0xff] %vm48_vm0, %v1177_v4  ;;  %v883_v6 = vpop.f32.mrb[9].mxu1 }
 0x3be   :  { %930 = vst.msk [vmem:[%s1901_s3 + $0x40] sm:$0xff] %vm48_vm0, %v883_v6 }
 0x3c0   :  { %v1180_v7 = vpop.f32.mrb[10].mxu1 }
 0x3c1   :  { %933 = vst.msk [vmem:[%s1901_s3 + $0x58] sm:$0xff] %vm48_vm0, %v1180_v7  ;;  %v893_v56 = vpop.f32.mrb[11].mxu1 }
 0x3c2   :  { %932 = vst.msk [vmem:[%s1901_s3 + $0x50] sm:$0xff] %vm48_vm0, %v893_v56 }
 0x3c4   :  { %v1183_v57 = vpop.f32.mrb[12].mxu1 }
 0x3c5   :  { %935 = vst.msk [vmem:[%s1901_s3 + $0x68] sm:$0xff] %vm48_vm0, %v1183_v57  ;;  %v903_v3 = vpop.f32.mrb[13].mxu1 }
 0x3c6   :  { %934 = vst.msk [vmem:[%s1901_s3 + $0x60] sm:$0xff] %vm48_vm0, %v903_v3 }
 0x3c8   :  { %v1186_v12 = vpop.f32.mrb[14].mxu1 }
 0x3c9   :  { %937 = vst.msk [vmem:[%s1901_s3 + $0x78] sm:$0xff] %vm48_vm0, %v1186_v12  ;;  %v913_v14 = vpop.f32.mrb[15].mxu1 }
 0x3ca   :  { %936 = vst.msk [vmem:[%s1901_s3 + $0x70] sm:$0xff] %vm48_vm0, %v913_v14 }

</bundles_post_ra>
